<compile_context>
chip_gen: v5e
topology: v5e:2x2
jax: 0.10.0
libtpu: 0.0.40
codegen_flags: <defaults>
</compile_context>

<pallas_src>
import math
import functools

import numpy as np
import jax
import jax.numpy as jnp
from jax.experimental import pallas as pl
from jax.experimental.pallas import tpu as pltpu


def _vmem_limit_bytes():
    """Generation-aware scoped-VMEM budget (~3/4 of physical, capped)."""
    cap = 64 * 1024 * 1024
    try:
        info = pltpu.get_tpu_info()
        cap = int(getattr(info, "vmem_capacity_bytes", cap)) or cap
    except Exception:
        pass
    return int(min(cap * 3 // 4, 100 * 1024 * 1024))


_VMEM_LIMIT = _vmem_limit_bytes()


def _pick_tile(dim, candidates):
    """Largest candidate tile that evenly divides `dim`, else the full dim."""
    for c in candidates:
        if c <= dim and dim % c == 0:
            return c
    return dim


# ----------------------------------------------------------------------------
# Weight-resident matmul: out = act(x @ w + b [+ residual])
#   grid = (M-tiles,).  The weight / bias BlockSpecs have a constant index map,
#   so they are copied into VMEM once and reused for every M tile.  Optional
#   residual add and tanh-GELU are fused into the single finalize.
# ----------------------------------------------------------------------------
def _matmul_wres_kernel(*refs, activation, has_residual):
    if has_residual:
        x_ref, w_ref, b_ref, r_ref, o_ref = refs
    else:
        x_ref, w_ref, b_ref, o_ref = refs
        r_ref = None
    acc = jnp.dot(x_ref[...], w_ref[...], preferred_element_type=jnp.float32)
    acc = acc + b_ref[...]
    if r_ref is not None:
        acc = acc + r_ref[...].astype(jnp.float32)
    if activation == "gelu":
        acc = jax.nn.gelu(acc, approximate=True)   # tanh form -> EUP slot
    o_ref[...] = acc.astype(o_ref.dtype)


def matmul_wres(x, w, b, *, residual=None, activation=None,
                out_dtype=jnp.bfloat16):
    M, K = x.shape
    Kw, N = w.shape
    assert K == Kw
    tm = _pick_tile(M, (512, 256, 128, 64, 32, 16))
    grid = (M // tm,)

    in_specs = [pl.BlockSpec((tm, K), lambda i: (i, 0)),
                pl.BlockSpec((K, N), lambda i: (0, 0)),     # resident weight
                pl.BlockSpec((1, N), lambda i: (0, 0))]     # resident bias
    args = [x, w, b]
    if residual is not None:
        in_specs.append(pl.BlockSpec((tm, N), lambda i: (i, 0)))
        args.append(residual)

    kern = functools.partial(_matmul_wres_kernel, activation=activation,
                             has_residual=residual is not None)
    return pl.pallas_call(
        kern,
        out_shape=jax.ShapeDtypeStruct((M, N), out_dtype),
        grid_spec=pltpu.PrefetchScalarGridSpec(
            num_scalar_prefetch=0,
            grid=grid,
            in_specs=in_specs,
            out_specs=pl.BlockSpec((tm, N), lambda i: (i, 0))),
        compiler_params=pltpu.CompilerParams(
            dimension_semantics=("parallel",),
            vmem_limit_bytes=_VMEM_LIMIT),
    )(*args)


# ----------------------------------------------------------------------------
# Flash-style multi-head attention.
#   q, k, v are (B, H, S, hd); grid = (B*q-tiles, kv-tiles) -- batch and
#   q-tiles merged into one leading parallel axis; online softmax state in
#   VMEM scratch; one batched heads-leading contraction handles all heads.
#   The 1/sqrt(hd) scale is applied to q (smaller than the score tile).
# ----------------------------------------------------------------------------
def _mha_kernel(mask_ref, q_ref, k_ref, v_ref, o_ref,
                m_scr, l_scr, acc_scr, *, scale, kv_steps):
    ki = pl.program_id(1)

    @pl.when(ki == 0)
    def _():
        m_scr[...] = jnp.full(m_scr.shape, -jnp.inf, dtype=m_scr.dtype)
        l_scr[...] = jnp.zeros_like(l_scr)
        acc_scr[...] = jnp.zeros_like(acc_scr)

    q = q_ref[0] * scale                           # (H, tq, hd)  scaled q
    kk = k_ref[0]                                  # (H, tkv, hd)
    vv = v_ref[0]                                  # (H, tkv, hd)

    s = jnp.einsum('hqd,hkd->hqk', q, kk,
                   preferred_element_type=jnp.float32)
    s = s + mask_ref[...]                          # (1, 1, tkv) additive key mask

    m_prev = m_scr[...]
    m_new = jnp.maximum(m_prev, jnp.max(s, axis=-1, keepdims=True))
    alpha = jnp.exp(m_prev - m_new)
    p = jnp.exp(s - m_new)
    l_scr[...] = alpha * l_scr[...] + jnp.sum(p, axis=-1, keepdims=True)
    acc_scr[...] = alpha * acc_scr[...] + jnp.einsum(
        'hqk,hkd->hqd', p.astype(vv.dtype), vv,
        preferred_element_type=jnp.float32)
    m_scr[...] = m_new

    @pl.when(ki == kv_steps - 1)
    def _():
        out = acc_scr[...] * pl.reciprocal(l_scr[...], approx=True)
        o_ref[0] = out.astype(o_ref.dtype)


def mha_attention(q, k, v, mask_bias):
    B, H, S, hd = q.shape
    tq = _pick_tile(S, (256, 128, 64, 32, 16))
    tkv = _pick_tile(S, (256, 128, 64, 32, 16))
    nq = S // tq
    grid = (B * nq, S // tkv)
    kern = functools.partial(_mha_kernel, scale=1.0 / math.sqrt(hd),
                             kv_steps=grid[1])
    return pl.pallas_call(
        kern,
        out_shape=jax.ShapeDtypeStruct((B, H, S, hd), jnp.bfloat16),
        grid_spec=pltpu.PrefetchScalarGridSpec(
            num_scalar_prefetch=0,
            grid=grid,
            in_specs=[
                pl.BlockSpec((1, 1, tkv),
                             lambda i, ki: (i // nq, 0, ki)),
                pl.BlockSpec((1, H, tq, hd),
                             lambda i, ki: (i // nq, 0, i % nq, 0)),
                pl.BlockSpec((1, H, tkv, hd),
                             lambda i, ki: (i // nq, 0, ki, 0)),
                pl.BlockSpec((1, H, tkv, hd),
                             lambda i, ki: (i // nq, 0, ki, 0))],
            out_specs=pl.BlockSpec((1, H, tq, hd),
                                   lambda i, ki: (i // nq, 0, i % nq, 0)),
            scratch_shapes=[pltpu.VMEM((H, tq, 1), jnp.float32),
                            pltpu.VMEM((H, tq, 1), jnp.float32),
                            pltpu.VMEM((H, tq, hd), jnp.float32)]),
        compiler_params=pltpu.CompilerParams(
            dimension_semantics=("parallel", "arbitrary"),
            vmem_limit_bytes=_VMEM_LIMIT),
    )(mask_bias, q, k, v)


# ----------------------------------------------------------------------------
# LayerNorm (residual already fused into the preceding matmul), tiled over
# rows (f32 math, bf16 output).
# ----------------------------------------------------------------------------
def _layernorm_kernel(x_ref, g_ref, b_ref, o_ref, *, eps):
    x = x_ref[...].astype(jnp.float32)
    mu = jnp.mean(x, axis=-1, keepdims=True)
    var = jnp.mean(jnp.square(x - mu), axis=-1, keepdims=True)
    y = (x - mu) * jax.lax.rsqrt(var + eps)
    y = y * g_ref[...] + b_ref[...]
    o_ref[...] = y.astype(o_ref.dtype)


def layernorm(x, gamma, beta, *, eps=1e-5, out_dtype=jnp.bfloat16):
    M, D = x.shape
    tm = _pick_tile(M, (512, 256, 128, 64, 32, 16))
    grid = (M // tm,)
    kern = functools.partial(_layernorm_kernel, eps=eps)
    return pl.pallas_call(
        kern,
        out_shape=jax.ShapeDtypeStruct((M, D), out_dtype),
        grid_spec=pltpu.PrefetchScalarGridSpec(
            num_scalar_prefetch=0,
            grid=grid,
            in_specs=[pl.BlockSpec((tm, D), lambda i: (i, 0)),
                      pl.BlockSpec((1, D), lambda i: (0, 0)),
                      pl.BlockSpec((1, D), lambda i: (0, 0))],
            out_specs=pl.BlockSpec((tm, D), lambda i: (i, 0))),
        compiler_params=pltpu.CompilerParams(
            dimension_semantics=("parallel",),
            vmem_limit_bytes=_VMEM_LIMIT),
    )(x, gamma, beta)


# ----------------------------------------------------------------------------
# Masked LM head: vocab-tiled matmul with streaming log-softmax.
#   Pass 1: grid (M-tiles, V-tiles); tk = K (resident per-vocab-tile weight
#           column block); bf16 logits tiles + running (max, sum-exp) scratch
#           finalized into a per-row logsumexp.
#   Pass 2: grid (M-tiles, V-tiles): log-probs = logits - lse (f32 output,
#           matching the reference log_softmax dtype).
# ----------------------------------------------------------------------------
def _lm_pass1_kernel(x_ref, w_ref, b_ref, logits_ref, lse_ref,
                     mrun_ref, srun_ref, *, v_steps):
    j = pl.program_id(1)

    @pl.when(j == 0)
    def _():
        mrun_ref[...] = jnp.full(mrun_ref.shape, -jnp.inf, dtype=mrun_ref.dtype)
        srun_ref[...] = jnp.zeros_like(srun_ref)

    logits = jnp.dot(x_ref[...], w_ref[...],
                     preferred_element_type=jnp.float32) + b_ref[...]
    logits_q = logits.astype(logits_ref.dtype)
    logits_ref[...] = logits_q
    lq = logits_q.astype(jnp.float32)   # normalize exactly what was stored
    m_prev = mrun_ref[...]
    m_new = jnp.maximum(m_prev, jnp.max(lq, axis=-1, keepdims=True))
    srun_ref[...] = (srun_ref[...] * jnp.exp(m_prev - m_new)
                     + jnp.sum(jnp.exp(lq - m_new), axis=-1, keepdims=True))
    mrun_ref[...] = m_new

    @pl.when(j == v_steps - 1)
    def _():
        lse_ref[...] = mrun_ref[...] + jnp.log(srun_ref[...])


def _lm_pass2_kernel(logits_ref, lse_ref, o_ref):
    o_ref[...] = logits_ref[...].astype(jnp.float32) - lse_ref[...]


def lm_head_logprobs(x, w, b):
    M, K = x.shape
    _, V = w.shape
    tm = _pick_tile(M, (1024, 512, 256, 128, 64, 32, 16))
    tv = _pick_tile(V, (512, 256, 128))

    grid1 = (M // tm, V // tv)
    kern1 = functools.partial(_lm_pass1_kernel, v_steps=grid1[1])
    logits, lse = pl.pallas_call(
        kern1,
        out_shape=(jax.ShapeDtypeStruct((M, V), jnp.bfloat16),
                   jax.ShapeDtypeStruct((M, 1), jnp.float32)),
        grid_spec=pltpu.PrefetchScalarGridSpec(
            num_scalar_prefetch=0,
            grid=grid1,
            in_specs=[pl.BlockSpec((tm, K), lambda i, j: (i, 0)),
                      pl.BlockSpec((K, tv), lambda i, j: (0, j)),
                      pl.BlockSpec((1, tv), lambda i, j: (0, j))],
            out_specs=[pl.BlockSpec((tm, tv), lambda i, j: (i, j)),
                       pl.BlockSpec((tm, 1), lambda i, j: (i, 0))],
            scratch_shapes=[pltpu.VMEM((tm, 1), jnp.float32),
                            pltpu.VMEM((tm, 1), jnp.float32)]),
        compiler_params=pltpu.CompilerParams(
            dimension_semantics=("parallel", "arbitrary"),
            vmem_limit_bytes=_VMEM_LIMIT),
    )(x, w, b)

    grid2 = (M // tm, V // tv)
    logp = pl.pallas_call(
        _lm_pass2_kernel,
        out_shape=jax.ShapeDtypeStruct((M, V), jnp.float32),
        grid_spec=pltpu.PrefetchScalarGridSpec(
            num_scalar_prefetch=0,
            grid=grid2,
            in_specs=[pl.BlockSpec((tm, tv), lambda i, j: (i, j)),
                      pl.BlockSpec((tm, 1), lambda i, j: (i, 0))],
            out_specs=pl.BlockSpec((tm, tv), lambda i, j: (i, j))),
        compiler_params=pltpu.CompilerParams(
            dimension_semantics=("parallel", "parallel"),
            vmem_limit_bytes=_VMEM_LIMIT),
    )(logits, lse)
    return logp


# ----------------------------------------------------------------------------
# Winner head: x[:, 0] -> linear(hidden, 2) -> log_softmax.
#   The 2-wide output is padded to 128 lanes (lane-dense store), masked
#   in-kernel and sliced outside.
# ----------------------------------------------------------------------------
def _winner_kernel(x_ref, w_ref, b_ref, o_ref, *, n_classes):
    logits = jnp.dot(x_ref[...], w_ref[...],
                     preferred_element_type=jnp.float32) + b_ref[...]
    lane = jax.lax.broadcasted_iota(jnp.int32, logits.shape, 1)
    logits = jnp.where(lane < n_classes, logits, -1e30)
    m = jnp.max(logits, axis=-1, keepdims=True)
    z = logits - m
    lse = jnp.log(jnp.sum(jnp.exp(z), axis=-1, keepdims=True))
    o_ref[...] = z - lse


def winner_head(x0, w_pad, b_pad, *, n_classes=2):
    B, _ = x0.shape
    n_pad = w_pad.shape[1]
    vmem = pl.BlockSpec(memory_space=pltpu.MemorySpace.VMEM)
    out = pl.pallas_call(
        functools.partial(_winner_kernel, n_classes=n_classes),
        out_shape=jax.ShapeDtypeStruct((B, n_pad), jnp.float32),
        in_specs=[vmem, vmem, vmem],
        out_specs=vmem,
        compiler_params=pltpu.CompilerParams(vmem_limit_bytes=_VMEM_LIMIT),
    )(x0, w_pad, b_pad)
    return out[:, :n_classes]


# ----------------------------------------------------------------------------
# Encoder layer = MHA + residual + LN + FFN(GELU) + residual + LN
# (same LayerNorm params for both norms, as in the reference module; dropouts
#  are identity in eval mode; residual adds fused into out-proj / FFN2).
# ----------------------------------------------------------------------------
def encoder_layer_forward(x, mask_bias, p, *, B, S, D, H):
    hd = D // H
    qkv = matmul_wres(x, p['wqkv'], p['bqkv'])               # (B*S, 3D) bf16

    def split_heads(t):
        return t.reshape(B, S, H, hd).transpose(0, 2, 1, 3)  # (B, H, S, hd)

    q = split_heads(qkv[:, 0:D])
    k = split_heads(qkv[:, D:2 * D])
    v = split_heads(qkv[:, 2 * D:3 * D])

    attn = mha_attention(q, k, v, mask_bias)                 # (B, H, S, hd)
    attn = attn.transpose(0, 2, 1, 3).reshape(B * S, D)

    ares = matmul_wres(attn, p['wo'], p['bo'], residual=x)   # out-proj + res
    x1 = layernorm(ares, p['ln_g'], p['ln_b'])

    h1 = matmul_wres(x1, p['w1'], p['b1'], activation="gelu")
    ffres = matmul_wres(h1, p['w2'], p['b2'], residual=x1)   # FFN2 + res
    return layernorm(ffres, p['ln_g'], p['ln_b'])


# ----------------------------------------------------------------------------
# Plain-JAX glue: positional table (exact reference formula), parameter init,
# full forward.
# ----------------------------------------------------------------------------
def positional_table(seq_len, d_model):
    pe = np.zeros((seq_len, d_model), dtype=np.float32)
    for pos in range(seq_len):
        for i in range(0, d_model, 2):
            pe[pos, i] = math.sin(pos / 10000 ** (2 * i / d_model))
            pe[pos, i + 1] = math.cos(pos / 10000 ** (2 * (i + 1) / d_model))
    return jnp.asarray(pe)[None, :, :]                       # (1, S, D)


def init_params(key, *, vocab, D, n_layers, winner_pad=128):
    def nrm(k, shape, dtype=jnp.bfloat16, scale=0.02):
        return (scale * jax.random.normal(k, shape, dtype=jnp.float32)).astype(dtype)

    keys = iter(jax.random.split(key, 8 * n_layers + 8))
    p = {}
    tok = nrm(next(keys), (vocab, D), jnp.float32)
    p['token'] = tok.at[0].set(0.0)                           # padding_idx=0
    seg = nrm(next(keys), (3, D), jnp.float32)
    p['segment'] = seg.at[0].set(0.0)                         # padding_idx=0

    layers = []
    for _ in range(n_layers):
        layers.append({
            'wqkv': nrm(next(keys), (D, 3 * D)),
            'bqkv': nrm(next(keys), (1, 3 * D), jnp.float32),
            'wo':   nrm(next(keys), (D, D)),
            'bo':   nrm(next(keys), (1, D), jnp.float32),
            'ln_g': jnp.ones((1, D), jnp.float32),
            'ln_b': jnp.zeros((1, D), jnp.float32),
            'w1':   nrm(next(keys), (D, 4 * D)),
            'b1':   nrm(next(keys), (1, 4 * D), jnp.float32),
            'w2':   nrm(next(keys), (4 * D, D)),
            'b2':   nrm(next(keys), (1, D), jnp.float32),
        })
    p['layers'] = layers

    ww = nrm(next(keys), (D, 2), jnp.float32)
    bw = nrm(next(keys), (1, 2), jnp.float32)
    p['heads'] = {
        'wlm': nrm(next(keys), (D, vocab)),
        'blm': nrm(next(keys), (1, vocab), jnp.float32),
        'ww_pad': jnp.zeros((D, winner_pad), jnp.float32).at[:, :2].set(ww)
                     .astype(jnp.bfloat16),
        'bw_pad': jnp.zeros((1, winner_pad), jnp.float32).at[:, :2].set(bw),
    }
    return p


def bertlm_forward(tokens, segment_label, params, pe, *, D, H):
    B, S = tokens.shape
    V = params['token'].shape[0]

    # BERTEmbedding: token + positional + segment (dropout = identity in eval)
    x = (jnp.take(params['token'], tokens, axis=0)
         + pe
         + jnp.take(params['segment'], segment_label, axis=0))
    x = x.reshape(B * S, D).astype(jnp.bfloat16)

    # key_padding_mask (tokens == 0) as additive bias, shaped (B, 1, S)
    mask_bias = jnp.where(tokens == 0, -1e30, 0.0).astype(jnp.float32)[:, None, :]

    for lp in params['layers']:
        x = encoder_layer_forward(x, mask_bias, lp, B=B, S=S, D=D, H=H)

    x3 = x.reshape(B, S, D)
    win_logprob = winner_head(x3[:, 0, :],
                              params['heads']['ww_pad'], params['heads']['bw_pad'])
    lm_logprob = lm_head_logprobs(x, params['heads']['wlm'],
                                  params['heads']['blm']).reshape(B, S, V)
    return win_logprob, lm_logprob


# ----------------------------------------------------------------------------
if __name__ == "__main__":
    VOCAB = 32
    D_MODEL = 32
    N_LAYERS = 2
    HEADS = 4
    SEQ = 8
    BATCH = 2

    key = jax.random.PRNGKey(0)
    k_tok, k_seg, k_par = jax.random.split(key, 3)

    tokens = jax.random.randint(k_tok, (BATCH, SEQ), 0, VOCAB, dtype=jnp.int32)
    # force a couple of padding tokens (id 0) but keep first token non-pad
    tokens = tokens.at[:, -1].set(0)
    tokens = tokens.at[:, 0].set(5)
    segment_label = jax.random.randint(k_seg, (BATCH, SEQ), 0, 3, dtype=jnp.int32)

    params = init_params(k_par, vocab=VOCAB, D=D_MODEL, n_layers=N_LAYERS)
    pe = positional_table(SEQ, D_MODEL)

    win_logprob, lm_logprob = bertlm_forward(tokens, segment_label, params, pe,
                                             D=D_MODEL, H=HEADS)
    jax.block_until_ready((win_logprob, lm_logprob))

    assert win_logprob.shape == (BATCH, 2)
    assert lm_logprob.shape == (BATCH, SEQ, VOCAB)
    # log-softmax rows must sum (in prob space) to ~1
    assert bool(jnp.allclose(jnp.exp(win_logprob).sum(-1), 1.0, atol=1e-4))
    assert bool(jnp.allclose(jnp.exp(lm_logprob).sum(-1), 1.0, atol=1e-4))
    assert bool(jnp.isfinite(win_logprob).all())
    assert bool(jnp.isfinite(lm_logprob).all())

    print("KERNEL_OK")
</pallas_src>

<mosaic_0001>
module attributes {stable_mosaic.version = 11 : i64} {
  func.func @_matmul_wres_kernel(%arg0: i32, %arg1: memref<16x32xbf16, #tpu.memory_space<vmem>>, %arg2: memref<32x96xbf16, #tpu.memory_space<vmem>>, %arg3: memref<1x96xf32, #tpu.memory_space<vmem>>, %arg4: memref<16x96xbf16, #tpu.memory_space<vmem>>) attributes {dimension_semantics = [#tpu.dimension_semantics<parallel>], iteration_bounds = array<i64: 1>, scalar_prefetch = 0 : i64, scratch_operands = 0 : i64, tpu.core_type = #tpu.core_type<tc>, window_params = [{transform_indices = @transform_0, window_bounds = array<i64: 16, 32>}, {pipeline_mode = #tpu.pipeline_mode<synchronous>, transform_indices = @transform_1, window_bounds = array<i64: 32, 96>}, {pipeline_mode = #tpu.pipeline_mode<synchronous>, transform_indices = @transform_2, window_bounds = array<i64: 1, 96>}, {transform_indices = @transform_3, window_bounds = array<i64: 16, 96>}]} {
    %c0 = arith.constant 0 : index
    %c0_0 = arith.constant 0 : index
    %0 = vector.load %arg1[%c0, %c0_0] : memref<16x32xbf16, #tpu.memory_space<vmem>>, vector<16x32xbf16>
    %c0_1 = arith.constant 0 : index
    %c0_2 = arith.constant 0 : index
    %1 = vector.load %arg2[%c0_1, %c0_2] : memref<32x96xbf16, #tpu.memory_space<vmem>>, vector<32x96xbf16>
    %cst = arith.constant dense<0.000000e+00> : vector<16x96xf32>
    %2 = tpu.matmul %0, %1, %cst {dimension_numbers = #tpu.dot_dimension_numbers<[1], [0], [0], [1], [0, 0, 1, 1], [], []>} : vector<16x32xbf16>, vector<32x96xbf16>, vector<16x96xf32> -> vector<16x96xf32>
    %c0_3 = arith.constant 0 : index
    %c0_4 = arith.constant 0 : index
    %3 = vector.load %arg3[%c0_3, %c0_4] : memref<1x96xf32, #tpu.memory_space<vmem>>, vector<1x96xf32>
    %4 = vector.broadcast %3 : vector<1x96xf32> to vector<16x96xf32>
    %5 = arith.addf %2, %4 : vector<16x96xf32>
    %6 = arith.truncf %5 : vector<16x96xf32> to vector<16x96xbf16>
    %c0_5 = arith.constant 0 : index
    %c0_6 = arith.constant 0 : index
    %7 = vector.load %arg4[%c0_5, %c0_6] : memref<16x96xbf16, #tpu.memory_space<vmem>>, vector<16x96xbf16>
    tpu.vector_store %arg4[%c0_5, %c0_6], %6 {strides = array<i32>} : memref<16x96xbf16, #tpu.memory_space<vmem>>, vector<16x96xbf16>,
    return
  }
  func.func @transform_0(%arg0: i32) -> (i32, i32) {
    %c0_i32 = arith.constant 0 : i32
    %c0_i32_0 = arith.constant 0 : i32
    return %arg0, %c0_i32 : i32, i32
  }
  func.func @transform_1(%arg0: i32) -> (i32, i32) {
    %c0_i32 = arith.constant 0 : i32
    %c0_i32_0 = arith.constant 0 : i32
    %c0_i32_1 = arith.constant 0 : i32
    return %c0_i32, %c0_i32_0 : i32, i32
  }
  func.func @transform_2(%arg0: i32) -> (i32, i32) {
    %c0_i32 = arith.constant 0 : i32
    %c0_i32_0 = arith.constant 0 : i32
    %c0_i32_1 = arith.constant 0 : i32
    return %c0_i32, %c0_i32_0 : i32, i32
  }
  func.func @transform_3(%arg0: i32) -> (i32, i32) {
    %c0_i32 = arith.constant 0 : i32
    %c0_i32_0 = arith.constant 0 : i32
    return %arg0, %c0_i32 : i32, i32
  }
}

</mosaic_0001>

<bundles_post_ra>
// kernel: tpu_custom_call.1
= control target key start
LH: loop header
LB: loop body
LE: loop exit
PB: predicated region body
PF: predicated region fallthrough
CT: control target
= control target key end

     0   :  { %8 = vsyncpa [#allocation3], 0  ;;  %s264_s0 = inlined_call_operand.hbm [shape: bf16[16,32], index: 0, kind: input, shape index: {}]   ;;  %s265_s1 = inlined_call_operand.hbm [shape: bf16[32,96], index: 1, kind: input, shape index: {}]   ;;  %s266_s2 = inlined_call_operand.vmem [shape: f32[1,96], index: 2, kind: input, shape index: {}]   ;;  %s267_s3 = inlined_call_operand.hbm [shape: bf16[16,96], index: 3, kind: output, shape index: {}]  }
   0x1   :  { %9 = vsyncpa [#allocation6], 0 }
   0x2   :  { %10 = vsyncpa [#allocation4], 0  ;;  %s15_s14 = sshll.u32 %s264_s0, 4  ;;  %s218_s15 = smov [#allocation2]   ;;  %s16_s14 = int_to_ptr.hbm [resolvable:$true] %s15_s14 }
   0x3   :  { %s17_s16 = sshll.u32 %s218_s15, 4  ;;  %s28_s19 = sshll.u32 %s265_s1, 4  ;;  %s18_s16 = int_to_ptr.vmem [resolvable:$true] %s17_s16  ;;  %s29_s19 = int_to_ptr.hbm [resolvable:$true] %s28_s19 }
   0x4   :  { %s219_s20 = smov 64   ;;  %s220_s21 = smov 4  }
   0x5   :  { %23 = dma.hbm_to_vmem [thread:$0]  %s16_s14, 128, %s18_s16, [#allocation3], %s219_s20, %s219_s20, %s220_s21  }
   0x6   :  { %s221_s22 = smov [#allocation5]  }
   0x7   :  { %s30_s23 = sshll.u32 %s221_s22, 4  ;;  %s31_s23 = int_to_ptr.vmem [resolvable:$true] %s30_s23 }
   0x8   :  { %36 = dma.hbm_to_vmem [thread:$0]  %s29_s19, 256, %s31_s23, [#allocation6], %s219_s20, %s219_s20, %s220_s21  }
   0x9   :  { %212 = dma.done.wait [#allocation3], 128  }
   0xa   :  { %213 = vsyncadd [#allocation3], 4294967168 }
   0xb   :  { %214 = dma.done.wait [#allocation6], 256  }
   0xc   :  { %215 = vsyncadd [#allocation6], 4294967040  ;;  %v133_v0 = vld [vmem:[#allocation5 + $0x8] sm:$0xff]  ;;  %v132_v1 = vld [vmem:[#allocation5] sm:$0xff]  ;;  %vm75_vm0 = vcmask 261120   ;;  %vm95_vm1 = vcmask 781312  }
   0xd   :  { %85 = vmatpush.bf16.msra.mxu0 %v133_v0  ;;  %v131_v2 = vld [vmem:[#allocation2] sm:$0xff]  ;;  %s222_s24 = smov [#allocation7]   ;;  %s104_s28 = sshll.u32 %s267_s3, 4  ;;  %s105_s28 = int_to_ptr.hbm [resolvable:$true] %s104_s28 }
   0xe   :  { %v139_v3 = vld [vmem:[%s266_s2] ss:$0 sm:$0xff]  ;;  %s102_s25 = sshll.u32 %s222_s24, 4  ;;  %s103_s25 = int_to_ptr.vmem [resolvable:$true] %s102_s25 }
  0x11   :  { %86 = vmatpush.bf16.msra.mxu0 %v132_v1 }
  0x14   :  { %130 = vmatmul.msk.bf16.vlgmr.msra.gmra.mxu0 %vm75_vm0, %v131_v2 }
  0x91   :  { %v88_v4 = vpop.f32.mrf.mxu0 }
  0x92   :  { %v89_v5 = vadd.f32 %v139_v3, %v88_v4 }
  0x94   :  { %v93_v6 = vpack.c.bf16 %v89_v5, %v89_v5 }
  0x96   :  { %96 = vst.msk [vmem:[#allocation7] sm:$0xf] %vm95_vm1, %v93_v6 }
  0x99   :  { %v90_v7 = vpop.f32.mrf.mxu0 }
  0x9a   :  { %v91_v8 = vadd.f32 %v139_v3, %v90_v7 }
  0x9c   :  { %v94_v9 = vpack.c.bf16 %v91_v8, %v91_v8 }
  0x9e   :  { %97 = vst.msk [vmem:[#allocation7 + $0x4] sm:$0xf] %vm95_vm1, %v94_v9 }
  0x9f   :  { %110 = dma.vmem_to_hbm [thread:$0]  %s103_s25, 128, %s105_s28, [#allocation4], %s219_s20, %s219_s20, %s220_s21  }
  0xa0   :  { %216 = dma.done.wait [#allocation4], 128  }
  0xa1   :  { %217 = vsyncadd [#allocation4], 4294967168 }
  0xa2   :  { %115 = vsyncpa [#allocation3], 1 }
  0xa3   :  { %116 = vsyncpa [#allocation6], 1 }
  0xa4   :  { %117 = vsyncpa [#allocation4], 1 }

</bundles_post_ra>
